<compile_context>
chip_gen: v6e
topology: v6e:2x2x1
jax: 0.10.0
libtpu: 0.0.40
codegen_flags: <defaults>
</compile_context>

<pallas_src>
import functools

import jax
import jax.numpy as jnp
from jax.experimental import pallas as pl
from jax.experimental.pallas import tpu as pltpu

LANE = 128
H1, H2 = 128, 256           # hidden widths of lin1 / lin2 (fixed by the module)
NEG_BIG = -1e30             # padded-lane bias: exp(NEG_BIG - m) underflows to 0


def actor_kernel(x_ref, w1_ref, b1_ref, w2_ref, b2_ref, w3_ref, b3_ref, out_ref):
    # x tile: (TILE_B, state_dim) f32 -> bf16 for the MXU, f32 accumulation.
    x = x_ref[...].astype(jnp.bfloat16)

    # lin1 + relu; store the intermediate as bf16 (halves spill/store bytes).
    h1 = jnp.dot(x, w1_ref[...], preferred_element_type=jnp.float32) + b1_ref[...]
    h1 = jnp.maximum(h1, 0.0).astype(jnp.bfloat16)

    # lin2 + relu
    h2 = jnp.dot(h1, w2_ref[...], preferred_element_type=jnp.float32) + b2_ref[...]
    h2 = jnp.maximum(h2, 0.0).astype(jnp.bfloat16)

    # lin3 -> lane-padded logits (padded lanes carry -1e30 bias => exp() == 0,
    # so they don't pollute the softmax denominator)
    logits = jnp.dot(h2, w3_ref[...], preferred_element_type=jnp.float32) + b3_ref[...]

    # numerically stable softmax along the (128-lane) action dim
    m = jnp.max(logits, axis=-1, keepdims=True)
    e = jnp.exp(logits - m)
    denom = jnp.sum(e, axis=-1, keepdims=True)
    out_ref[...] = (e * pl.reciprocal(denom, approx=True)).astype(out_ref.dtype)


def _round_up(x, m):
    return ((x + m - 1) // m) * m


def _choose_tiling(batch, cap=2048, split_at=512):
    """Pick (tile_b, num_tiles).

    * Small batches -> a single tile (just round up to the 8-sublane constraint).
    * Large batches -> tiles of up to `cap` rows, with an EVEN tile count so a
      v7x megacore shards the "parallel" batch axis across both TensorCores.
      cap=2048 keeps the double-buffered activations + output well inside the
      16 MiB (v5e) / 32 MiB (v6e, v7x) scoped-VMEM budgets.
    """
    batch8 = max(8, _round_up(batch, 8))
    if batch8 < split_at:
        return batch8, 1
    num_tiles = max(2, pl.cdiv(batch8, cap))
    if num_tiles % 2:
        num_tiles += 1
    tile_b = _round_up(pl.cdiv(batch8, num_tiles), 8)
    return tile_b, num_tiles


@functools.partial(jax.jit,
                   static_argnames=("action_dim", "tile_b", "out_dtype", "trim"))
def actor_forward(state, params, action_dim, *, tile_b=None,
                  out_dtype=jnp.bfloat16, trim=True):
    """Fused Actor MLP forward pass (batch-tiled Pallas kernel).

    state:  (batch, state_dim) float32
    params: dict produced by init_actor_params():
        w1 (state_dim, 128) bf16, b1 (1, 128) f32,
        w2 (128, 256)       bf16, b2 (1, 256) f32,
        w3p (256, 128)      bf16 (zero-padded lanes >= action_dim),
        b3p (1, 128)        f32  (-1e30 on padded lanes).
    Returns:
        trim=True  -> (batch, action_dim) probabilities (rows sum to ~1).
        trim=False -> lane-dense padded (padded_batch, 128) slab in `out_dtype`
                      (cheapest HBM path; padded lanes/rows to be ignored by
                      the consumer).
    """
    w1, b1 = params["w1"], params["b1"]
    w2, b2 = params["w2"], params["b2"]
    w3p, b3p = params["w3p"], params["b3p"]

    batch, state_dim = state.shape
    pad_lanes = w3p.shape[1]

    if tile_b is None:
        tile_b, num_tiles = _choose_tiling(batch)
    else:
        tile_b = max(8, _round_up(tile_b, 8))
        num_tiles = pl.cdiv(max(batch, 1), tile_b)
    padded_batch = tile_b * num_tiles

    # Pad batch rows (zeros) so the grid tiles evenly; trimmed / ignored below.
    if padded_batch != batch:
        state = jnp.pad(state, ((0, padded_batch - batch), (0, 0)))

    resident = lambda i: (0, 0)  # weights/biases keep the same block -> stay resident
    out = pl.pallas_call(
        actor_kernel,
        out_shape=jax.ShapeDtypeStruct((padded_batch, pad_lanes), out_dtype),
        grid=(num_tiles,),
        in_specs=[
            pl.BlockSpec((tile_b, state_dim), lambda i: (i, 0)),
            pl.BlockSpec(w1.shape, resident),
            pl.BlockSpec(b1.shape, resident),
            pl.BlockSpec(w2.shape, resident),
            pl.BlockSpec(b2.shape, resident),
            pl.BlockSpec(w3p.shape, resident),
            pl.BlockSpec(b3p.shape, resident),
        ],
        out_specs=pl.BlockSpec((tile_b, pad_lanes), lambda i: (i, 0)),
        compiler_params=pltpu.CompilerParams(
            # batch tiles shard across v7x's 2 TensorCores; no-op on v5e/v6e.
            dimension_semantics=("parallel",),
            # explicit budget: safe on v5e (raises 16 MiB default) and within
            # v7x's 64 MiB physical VMEM.
            vmem_limit_bytes=32 * 1024 * 1024,
        ),
    )(state, w1, b1, w2, b2, w3p, b3p)

    if trim:
        return out[:batch, :action_dim]
    return out


def init_actor_params(key, state_dim, action_dim):
    """Mimics PyTorch nn.Linear default init: U(-1/sqrt(fan_in), +1/sqrt(fan_in)).

    Weights stored transposed vs PyTorch ((in, out)) and cast to bf16 for the MXU;
    biases kept in f32 as (1, out) rows.  The lin3 weight/bias are lane-padded to
    128 here (one-time prep) so the hot forward pass does no padding work:
    padded weight columns are zero and padded bias lanes are -1e30 (exp -> 0).
    """
    def linear(k, fan_in, fan_out):
        kw, kb = jax.random.split(k)
        bound = 1.0 / jnp.sqrt(jnp.float32(fan_in))
        w = jax.random.uniform(kw, (fan_in, fan_out), jnp.float32, -bound, bound)
        b = jax.random.uniform(kb, (1, fan_out), jnp.float32, -bound, bound)
        return w, b

    k1, k2, k3 = jax.random.split(key, 3)
    w1, b1 = linear(k1, state_dim, H1)
    w2, b2 = linear(k2, H1, H2)
    w3, b3 = linear(k3, H2, action_dim)

    pad_lanes = max(LANE, _round_up(action_dim, LANE))
    w3p = jnp.zeros((H2, pad_lanes), jnp.float32).at[:, :action_dim].set(w3)
    b3p = jnp.full((1, pad_lanes), NEG_BIG, jnp.float32).at[:, :action_dim].set(b3)

    return {
        "w1": w1.astype(jnp.bfloat16), "b1": b1,
        "w2": w2.astype(jnp.bfloat16), "b2": b2,
        "w3p": w3p.astype(jnp.bfloat16), "b3p": b3p,
    }


def actor_forward_ref(state, params, action_dim):
    """Pure-JAX reference with the kernel's numerics (bf16 dots, f32 accum)."""
    def mm(x, w):
        return jnp.dot(x.astype(jnp.bfloat16), w, preferred_element_type=jnp.float32)

    h1 = jnp.maximum(mm(state, params["w1"]) + params["b1"], 0.0).astype(jnp.bfloat16)
    h2 = jnp.maximum(mm(h1, params["w2"]) + params["b2"], 0.0).astype(jnp.bfloat16)
    logits = mm(h2, params["w3p"]) + params["b3p"]
    return jax.nn.softmax(logits, axis=-1)[:, :action_dim]


if __name__ == "__main__":
    key = jax.random.PRNGKey(0)
    k_params, k_state1, k_state2, k_state3 = jax.random.split(key, 4)

    state_dim, action_dim = 16, 6
    params = init_actor_params(k_params, state_dim, action_dim)

    # Case 1: tiny batch, default fast path (bf16 output, trimmed to action_dim).
    batch = 8
    state = jax.random.normal(k_state1, (batch, state_dim), dtype=jnp.float32)
    probs = actor_forward(state, params, action_dim)
    jax.block_until_ready(probs)
    ref = actor_forward_ref(state, params, action_dim)
    assert probs.shape == (batch, action_dim)
    # bf16 output + approx reciprocal => a few e-3 absolute deviation.
    assert jnp.allclose(probs.astype(jnp.float32), ref, atol=1.5e-2, rtol=1.5e-2)
    assert jnp.allclose(jnp.sum(probs.astype(jnp.float32), axis=-1), 1.0, atol=1.5e-2)

    # Case 2: multi-tile grid with batch padding, f32 output (exact-parity path).
    batch2 = 40
    state2 = jax.random.normal(k_state2, (batch2, state_dim), dtype=jnp.float32)
    probs2 = actor_forward(state2, params, action_dim, tile_b=16,
                           out_dtype=jnp.float32)
    jax.block_until_ready(probs2)
    ref2 = actor_forward_ref(state2, params, action_dim)
    assert probs2.shape == (batch2, action_dim)
    assert jnp.allclose(probs2, ref2, atol=5e-3, rtol=5e-3)
    assert jnp.allclose(jnp.sum(probs2, axis=-1), 1.0, atol=5e-3)

    # Case 3: auto-tiling split path (even #tiles for v7x), untrimmed lane-dense
    # output slab; consumer ignores padded rows/lanes.
    batch3 = 520
    state3 = jax.random.normal(k_state3, (batch3, state_dim), dtype=jnp.float32)
    out3 = actor_forward(state3, params, action_dim, trim=False)
    jax.block_until_ready(out3)
    assert out3.shape[1] == LANE and out3.shape[0] >= batch3
    ref3 = actor_forward_ref(state3, params, action_dim)
    probs3 = out3[:batch3, :action_dim].astype(jnp.float32)
    assert jnp.allclose(probs3, ref3, atol=1.5e-2, rtol=1.5e-2)
    assert jnp.allclose(jnp.sum(probs3, axis=-1), 1.0, atol=1.5e-2)

    print("KERNEL_OK")
</pallas_src>

<mosaic_0001>
module attributes {stable_mosaic.version = 11 : i64} {
  func.func @actor_kernel(%arg0: i32, %arg1: memref<8x16xf32, #tpu.memory_space<vmem>>, %arg2: memref<16x128xbf16, #tpu.memory_space<vmem>>, %arg3: memref<1x128xf32, #tpu.memory_space<vmem>>, %arg4: memref<128x256xbf16, #tpu.memory_space<vmem>>, %arg5: memref<1x256xf32, #tpu.memory_space<vmem>>, %arg6: memref<256x128xbf16, #tpu.memory_space<vmem>>, %arg7: memref<1x128xf32, #tpu.memory_space<vmem>>, %arg8: memref<8x128xbf16, #tpu.memory_space<vmem>>) attributes {dimension_semantics = [#tpu.dimension_semantics<parallel>], iteration_bounds = array<i64: 1>, scalar_prefetch = 0 : i64, scratch_operands = 0 : i64, tpu.core_type = #tpu.core_type<tc>, window_params = [{transform_indices = @transform_0, window_bounds = array<i64: 8, 16>}, {pipeline_mode = #tpu.pipeline_mode<synchronous>, transform_indices = @transform_1, window_bounds = array<i64: 16, 128>}, {pipeline_mode = #tpu.pipeline_mode<synchronous>, transform_indices = @transform_2, window_bounds = array<i64: 1, 128>}, {pipeline_mode = #tpu.pipeline_mode<synchronous>, transform_indices = @transform_3, window_bounds = array<i64: 128, 256>}, {pipeline_mode = #tpu.pipeline_mode<synchronous>, transform_indices = @transform_4, window_bounds = array<i64: 1, 256>}, {pipeline_mode = #tpu.pipeline_mode<synchronous>, transform_indices = @transform_5, window_bounds = array<i64: 256, 128>}, {pipeline_mode = #tpu.pipeline_mode<synchronous>, transform_indices = @transform_6, window_bounds = array<i64: 1, 128>}, {transform_indices = @transform_7, window_bounds = array<i64: 8, 128>}]} {
    %c0 = arith.constant 0 : index
    %c0_0 = arith.constant 0 : index
    %0 = vector.load %arg1[%c0, %c0_0] : memref<8x16xf32, #tpu.memory_space<vmem>>, vector<8x16xf32>
    %1 = arith.truncf %0 : vector<8x16xf32> to vector<8x16xbf16>
    %c0_1 = arith.constant 0 : index
    %c0_2 = arith.constant 0 : index
    %2 = vector.load %arg2[%c0_1, %c0_2] : memref<16x128xbf16, #tpu.memory_space<vmem>>, vector<16x128xbf16>
    %cst = arith.constant dense<0.000000e+00> : vector<8x128xf32>
    %3 = tpu.matmul %1, %2, %cst {dimension_numbers = #tpu.dot_dimension_numbers<[1], [0], [0], [1], [0, 0, 1, 1], [], []>} : vector<8x16xbf16>, vector<16x128xbf16>, vector<8x128xf32> -> vector<8x128xf32>
    %c0_3 = arith.constant 0 : index
    %c0_4 = arith.constant 0 : index
    %4 = vector.load %arg3[%c0_3, %c0_4] : memref<1x128xf32, #tpu.memory_space<vmem>>, vector<1x128xf32>
    %5 = vector.broadcast %4 : vector<1x128xf32> to vector<8x128xf32>
    %6 = arith.addf %3, %5 : vector<8x128xf32>
    %cst_5 = arith.constant 0.000000e+00 : f32
    %7 = vector.broadcast %cst_5 : f32 to vector<8x128xf32>
    %8 = arith.maximumf %6, %7 : vector<8x128xf32>
    %9 = arith.truncf %8 : vector<8x128xf32> to vector<8x128xbf16>
    %c0_6 = arith.constant 0 : index
    %c0_7 = arith.constant 0 : index
    %10 = vector.load %arg4[%c0_6, %c0_7] : memref<128x256xbf16, #tpu.memory_space<vmem>>, vector<128x256xbf16>
    %cst_8 = arith.constant dense<0.000000e+00> : vector<8x256xf32>
    %11 = tpu.matmul %9, %10, %cst_8 {dimension_numbers = #tpu.dot_dimension_numbers<[1], [0], [0], [1], [0, 0, 1, 1], [], []>} : vector<8x128xbf16>, vector<128x256xbf16>, vector<8x256xf32> -> vector<8x256xf32>
    %c0_9 = arith.constant 0 : index
    %c0_10 = arith.constant 0 : index
    %12 = vector.load %arg5[%c0_9, %c0_10] : memref<1x256xf32, #tpu.memory_space<vmem>>, vector<1x256xf32>
    %13 = vector.broadcast %12 : vector<1x256xf32> to vector<8x256xf32>
    %14 = arith.addf %11, %13 : vector<8x256xf32>
    %cst_11 = arith.constant 0.000000e+00 : f32
    %15 = vector.broadcast %cst_11 : f32 to vector<8x256xf32>
    %16 = arith.maximumf %14, %15 : vector<8x256xf32>
    %17 = arith.truncf %16 : vector<8x256xf32> to vector<8x256xbf16>
    %c0_12 = arith.constant 0 : index
    %c0_13 = arith.constant 0 : index
    %18 = vector.load %arg6[%c0_12, %c0_13] : memref<256x128xbf16, #tpu.memory_space<vmem>>, vector<256x128xbf16>
    %cst_14 = arith.constant dense<0.000000e+00> : vector<8x128xf32>
    %19 = tpu.matmul %17, %18, %cst_14 {dimension_numbers = #tpu.dot_dimension_numbers<[1], [0], [0], [1], [0, 0, 1, 1], [], []>} : vector<8x256xbf16>, vector<256x128xbf16>, vector<8x128xf32> -> vector<8x128xf32>
    %c0_15 = arith.constant 0 : index
    %c0_16 = arith.constant 0 : index
    %20 = vector.load %arg7[%c0_15, %c0_16] : memref<1x128xf32, #tpu.memory_space<vmem>>, vector<1x128xf32>
    %21 = vector.broadcast %20 : vector<1x128xf32> to vector<8x128xf32>
    %22 = arith.addf %19, %21 : vector<8x128xf32>
    %cst_17 = arith.constant dense<0xFF800000> : vector<8xf32>
    %23 = vector.multi_reduction <maximumf>, %22, %cst_17 [1] : vector<8x128xf32> to vector<8xf32>
    %24 = vector.shape_cast %23 : vector<8xf32> to vector<8x1xf32>
    %25 = vector.broadcast %24 : vector<8x1xf32> to vector<8x128xf32>
    %26 = arith.subf %22, %25 : vector<8x128xf32>
    %27 = math.exp %26 : vector<8x128xf32>
    %cst_18 = arith.constant dense<0.000000e+00> : vector<8xf32>
    %28 = vector.multi_reduction <add>, %27, %cst_18 [1] : vector<8x128xf32> to vector<8xf32>
    %29 = vector.shape_cast %28 : vector<8xf32> to vector<8x1xf32>
    %30 = tpu.reciprocal %29 {approx = true} : vector<8x1xf32> -> vector<8x1xf32>
    %31 = vector.broadcast %30 : vector<8x1xf32> to vector<8x128xf32>
    %32 = arith.mulf %27, %31 : vector<8x128xf32>
    %33 = arith.truncf %32 : vector<8x128xf32> to vector<8x128xbf16>
    %c0_19 = arith.constant 0 : index
    %c0_20 = arith.constant 0 : index
    %34 = vector.load %arg8[%c0_19, %c0_20] : memref<8x128xbf16, #tpu.memory_space<vmem>>, vector<8x128xbf16>
    tpu.vector_store %arg8[%c0_19, %c0_20], %33 {strides = array<i32>} : memref<8x128xbf16, #tpu.memory_space<vmem>>, vector<8x128xbf16>,
    return
  }
  func.func @transform_0(%arg0: i32) -> (i32, i32) {
    %c0_i32 = arith.constant 0 : i32
    %c0_i32_0 = arith.constant 0 : i32
    return %arg0, %c0_i32 : i32, i32
  }
  func.func @transform_1(%arg0: i32) -> (i32, i32) {
    %c0_i32 = arith.constant 0 : i32
    %c0_i32_0 = arith.constant 0 : i32
    %c0_i32_1 = arith.constant 0 : i32
    return %c0_i32, %c0_i32_0 : i32, i32
  }
  func.func @transform_2(%arg0: i32) -> (i32, i32) {
    %c0_i32 = arith.constant 0 : i32
    %c0_i32_0 = arith.constant 0 : i32
    %c0_i32_1 = arith.constant 0 : i32
    return %c0_i32, %c0_i32_0 : i32, i32
  }
  func.func @transform_3(%arg0: i32) -> (i32, i32) {
    %c0_i32 = arith.constant 0 : i32
    %c0_i32_0 = arith.constant 0 : i32
    %c0_i32_1 = arith.constant 0 : i32
    return %c0_i32, %c0_i32_0 : i32, i32
  }
  func.func @transform_4(%arg0: i32) -> (i32, i32) {
    %c0_i32 = arith.constant 0 : i32
    %c0_i32_0 = arith.constant 0 : i32
    %c0_i32_1 = arith.constant 0 : i32
    return %c0_i32, %c0_i32_0 : i32, i32
  }
  func.func @transform_5(%arg0: i32) -> (i32, i32) {
    %c0_i32 = arith.constant 0 : i32
    %c0_i32_0 = arith.constant 0 : i32
    %c0_i32_1 = arith.constant 0 : i32
    return %c0_i32, %c0_i32_0 : i32, i32
  }
  func.func @transform_6(%arg0: i32) -> (i32, i32) {
    %c0_i32 = arith.constant 0 : i32
    %c0_i32_0 = arith.constant 0 : i32
    %c0_i32_1 = arith.constant 0 : i32
    return %c0_i32, %c0_i32_0 : i32, i32
  }
  func.func @transform_7(%arg0: i32) -> (i32, i32) {
    %c0_i32 = arith.constant 0 : i32
    %c0_i32_0 = arith.constant 0 : i32
    return %arg0, %c0_i32 : i32, i32
  }
}

</mosaic_0001>

<bundles_post_ra>
// kernel: actor_forward.1
= control target key start
LH: loop header
LB: loop body
LE: loop exit
PB: predicated region body
PF: predicated region fallthrough
CT: control target
= control target key end

     0   :  { %12 = vsyncpa [#allocation3], 0  ;;  %s813_s0 = inlined_call_operand.hbm [shape: f32[8,16], index: 0, kind: input, shape index: {}]   ;;  %s814_s1 = inlined_call_operand.hbm [shape: bf16[16,128], index: 1, kind: input, shape index: {}]   ;;  %s815_s2 = inlined_call_operand.vmem [shape: f32[1,128], index: 2, kind: input, shape index: {}]   ;;  %s816_s3 = inlined_call_operand.hbm [shape: bf16[128,256], index: 3, kind: input, shape index: {}]   ;;  %s817_s4 = inlined_call_operand.vmem [shape: f32[1,256], index: 4, kind: input, shape index: {}]   ;;  %s818_s5 = inlined_call_operand.hbm [shape: bf16[256,128], index: 5, kind: input, shape index: {}]   ;;  %s819_s6 = inlined_call_operand.vmem [shape: f32[1,128], index: 6, kind: input, shape index: {}]   ;;  %s820_s7 = inlined_call_operand.hbm [shape: bf16[8,128], index: 7, kind: output, shape index: {}]  }
   0x1   :  { %13 = vsyncpa [#allocation6], 0 }
   0x2   :  { %14 = vsyncpa [#allocation9], 0 }
   0x3   :  { %15 = vsyncpa [#allocation4], 0  ;;  %s731_s24 = smov [#allocation5]  }
   0x4   :  { %s31_s25 = sshll.u32 %s731_s24, 4  ;;  %s32_s25 = int_to_ptr.vmem [resolvable:$true] %s31_s25 }
   0x5   :  { %s631_s26 = scalar_lea.vmem %s32_s25, 128  ;;  %p636_p1 = scmp.lt.s32.totalorder %s32_s25, %s32_s25 }
   0x6   :  { %p632_p0 = scmp.ne.s32.totalorder %s32_s25, %s631_s26  ;;  %p637_p2 = scmp.lt.s32.totalorder %s631_s26, %s631_s26 }
   0x8   :  { %p638_p3 = por %p637_p2, %p636_p1 }
   0xa   :  { %p639_p4 = pnand %p638_p3, %p632_p0 }
   0xc   :  { %642 = shalt.err (!%p639_p4)
}
   0xd   :  { %s732_s27 = smov 64   ;;  %s733_s28 = smov 4  }
   0xe   :  { %37 = dma.hbm_to_vmem [thread:$0]  %s814_s1, 128, %s32_s25, [#allocation6], %s732_s27, %s732_s27, %s733_s28  }
   0xf   :  { %s734_s8 = smov [#allocation2]   ;;  %s735_s10 = smov [#allocation7]  }
  0x10   :  { %s22_s9 = sshll.u32 %s734_s8, 4  ;;  %s45_s11 = sshll.u32 %s735_s10, 4  ;;  %s23_s9 = int_to_ptr.vmem [resolvable:$true] %s22_s9  ;;  %s46_s11 = int_to_ptr.vmem [resolvable:$true] %s45_s11 }
  0x11   :  { %s651_s12 = scalar_lea.vmem %s23_s9, 128  ;;  %p656_p6 = scmp.lt.s32.totalorder %s23_s9, %s23_s9 }
  0x12   :  { %p652_p5 = scmp.ne.s32.totalorder %s23_s9, %s651_s12  ;;  %p657_p7 = scmp.lt.s32.totalorder %s651_s12, %s651_s12 }
  0x14   :  { %p658_p8 = por %p657_p7, %p656_p6 }
  0x16   :  { %p659_p9 = pnand %p658_p8, %p652_p5 }
  0x18   :  { %662 = shalt.err (!%p659_p9)
}
  0x19   :  { %25 = dma.hbm_to_vmem [thread:$0]  %s813_s0, 128, %s23_s9, [#allocation3]  }
  0x1a   :  { %s671_s15 = scalar_lea.vmem %s46_s11, 2048  ;;  %p676_p11 = scmp.lt.s32.totalorder %s46_s11, %s46_s11 }
  0x1b   :  { %p672_p10 = scmp.ne.s32.totalorder %s46_s11, %s671_s15  ;;  %p677_p12 = scmp.lt.s32.totalorder %s671_s15, %s671_s15 }
  0x1d   :  { %p678_p13 = por %p677_p12, %p676_p11 }
  0x1f   :  { %p679_p0 = pnand %p678_p13, %p672_p10 }
  0x21   :  { %682 = shalt.err (!%p679_p0)
}
  0x22   :  { %s736_s1 = smov 128   ;;  %s737_s16 = smov 8  }
  0x23   :  { %51 = dma.hbm_to_vmem [thread:$0]  %s816_s3, 2048, %s46_s11, [#allocation6], %s736_s1, %s736_s1, %s737_s16  }
  0x24   :  { %s738_s19 = smov [#allocation8]  }
  0x25   :  { %s59_s20 = sshll.u32 %s738_s19, 4  ;;  %s60_s20 = int_to_ptr.vmem [resolvable:$true] %s59_s20 }
  0x26   :  { %s691_s21 = scalar_lea.vmem %s60_s20, 2048  ;;  %p696_p2 = scmp.lt.s32.totalorder %s60_s20, %s60_s20 }
  0x27   :  { %p692_p1 = scmp.ne.s32.totalorder %s60_s20, %s691_s21  ;;  %p697_p3 = scmp.lt.s32.totalorder %s691_s21, %s691_s21 }
  0x29   :  { %p698_p4 = por %p697_p3, %p696_p2 }
  0x2b   :  { %p699_p5 = pnand %p698_p4, %p692_p1 }
  0x2d   :  { %702 = shalt.err (!%p699_p5)
}
  0x2e   :  { %65 = dma.hbm_to_vmem [thread:$0]  %s818_s5, 2048, %s60_s20, [#allocation9], %s732_s27, %s732_s27, %s733_s28  }
  0x2f   :  { %723 = dma.done.wait [#allocation3], 128  }
  0x30   :  { %724 = vsyncadd [#allocation3], 4294967168 }
  0x31   :  { %725 = dma.done.wait [#allocation6], 2176  }
  0x32   :  { %726 = vsyncadd [#allocation6], 4294965120 }
  0x33   :  { %727 = dma.done.wait [#allocation9], 2048  }
  0x34   :  { %728 = vsyncadd [#allocation9], 4294965248  ;;  %v739_v0 = vmov 0.0   ;;  %vm740_vm0 = vmmov 0   ;;  %v578_v1 = vld [vmem:[#allocation5] sm:$0xff]   ;;  %v81_v2 = vld [vmem:[#allocation2] sm:$0xff]  ;;  %v162_v45 = vlaneseq }
  0x35   :  { %560 = vmatprep.subr.bf16.mxu0 %v739_v0  ;;  %562 = vmatprep.mubr.msk.bf16.mxu0 %vm740_vm0, %v739_v0  ;;  %v82_v3 = vpack.c.bf16 %v81_v2, %v81_v2  ;;  %vm98_vm1 = vcmask 130048   ;;  %v579_v4 = vld [vmem:[#allocation7 + $0x74] ss:$8 sps:$4 sm:$0xff]   ;;  %v581_v5 = vld [vmem:[#allocation7 + $0x70] ss:$8 sps:$4 sm:$0xff]   ;;  %v741_v20 = vmov 0  }
  0x36   :  { %561 = vmatpush3.bf16.msra.mxu0 %v578_v1  ;;  %v582_v6 = vld [vmem:[#allocation7 + $0x64] ss:$8 sps:$4 sm:$0xff]   ;;  %252 = vmatprep.subr.bf16.mxu1 %v579_v4  ;;  %v584_v7 = vld [vmem:[#allocation7 + $0x60] ss:$8 sps:$4 sm:$0xff]   ;;  %v585_v8 = vld [vmem:[#allocation7 + $0x54] ss:$8 sps:$4 sm:$0xff]  }
  0x37   :  { %253 = vmatpush1.bf16.msra.mxu1 %v581_v5  ;;  %v587_v9 = vld [vmem:[#allocation7 + $0x50] ss:$8 sps:$4 sm:$0xff]   ;;  %v588_v10 = vld [vmem:[#allocation7 + $0x44] ss:$8 sps:$4 sm:$0xff]   ;;  %v590_v11 = vld [vmem:[#allocation7 + $0x40] ss:$8 sps:$4 sm:$0xff]   ;;  %284 = vmatprep.mubr.bf16.mxu1 %v741_v20 }
  0x38   :  { %254 = vmatprep.subr.bf16.mxu1 %v582_v6  ;;  %v591_v12 = vld [vmem:[#allocation7 + $0x34] ss:$8 sps:$4 sm:$0xff]   ;;  %v593_v13 = vld [vmem:[#allocation7 + $0x30] ss:$8 sps:$4 sm:$0xff]   ;;  %v594_v14 = vld [vmem:[#allocation7 + $0x24] ss:$8 sps:$4 sm:$0xff]  }
  0x39   :  { %563 = vmatmul.mubr.msk.bf16.vlgmr.msra.gmra.mxu0 %vm98_vm1, %v82_v3  ;;  %v596_v15 = vld [vmem:[#allocation7 + $0x20] ss:$8 sps:$4 sm:$0xff]   ;;  %v597_v16 = vld [vmem:[#allocation7 + $0x14] ss:$8 sps:$4 sm:$0xff]   ;;  %v599_v17 = vld [vmem:[#allocation7 + $0x10] ss:$8 sps:$4 sm:$0xff]  }
  0x3a   :  { %v600_v18 = vld [vmem:[#allocation7 + $0x4] ss:$8 sps:$4 sm:$0xff]   ;;  %v602_v19 = vld [vmem:[#allocation7] ss:$8 sps:$4 sm:$0xff]   ;;  %v603_v21 = vld [vmem:[#allocation8 + $0x78] sm:$0xff]   ;;  %v163_v46 = vshrl.u32 %v162_v45, 7 }
  0x3b   :  { %255 = vmatpush1.bf16.msra.mxu1 %v584_v7  ;;  %v604_v22 = vld [vmem:[#allocation8 + $0x38] sm:$0xff]   ;;  %v605_v23 = vld [vmem:[#allocation8 + $0x70] sm:$0xff]   ;;  %538 = vmatprep.subr.bf16.mxu0 %v603_v21  ;;  %v607_v25 = vld [vmem:[#allocation8 + $0x68] sm:$0xff]  }
  0x3c   :  { %256 = vmatprep.subr.bf16.mxu1 %v585_v8  ;;  %539 = vmatpush3.bf16.msra.mxu0 %v604_v22  ;;  %v606_v24 = vld [vmem:[#allocation8 + $0x30] sm:$0xff]   ;;  %v608_v26 = vld [vmem:[#allocation8 + $0x28] sm:$0xff]   ;;  %v609_v27 = vld [vmem:[#allocation8 + $0x60] sm:$0xff]   ;;  %v164_v47 = vsub.s32 0, %v163_v46  ;;  %v168_v49 = vsub.s32 1, %v163_v46 }
  0x3d   :  { %540 = vmatprep.subr.bf16.mxu0 %v605_v23  ;;  %v610_v28 = vld [vmem:[#allocation8 + $0x20] sm:$0xff]   ;;  %v611_v29 = vld [vmem:[#allocation8 + $0x58] sm:$0xff]   ;;  %v613_v31 = vld [vmem:[#allocation8 + $0x50] sm:$0xff]  }
  0x3e   :  { %v612_v30 = vld [vmem:[#allocation8 + $0x18] sm:$0xff]   ;;  %v614_v32 = vld [vmem:[#allocation8 + $0x10] sm:$0xff]   ;;  %v615_v41 = vld [vmem:[#allocation8 + $0x48] sm:$0xff]  }
  0x3f   :  { %257 = vmatpush1.bf16.msra.mxu1 %v587_v9  ;;  %v500_v33 = vld [vmem:[%s815_s2] ss:$0 sm:$0xff]  ;;  %v616_v42 = vld [vmem:[#allocation8 + $0x8] sm:$0xff]   ;;  %v617_v43 = vld [vmem:[#allocation8 + $0x40] sm:$0xff]  }
  0x40   :  { %258 = vmatprep.subr.bf16.mxu1 %v588_v10  ;;  %541 = vmatpush3.bf16.msra.mxu0 %v606_v24  ;;  %v618_v44 = vld [vmem:[#allocation8] sm:$0xff]   ;;  %v160_v48 = vld [vmem:[%s817_s4] sm:$0x3]  ;;  %s742_s4 = smov [#allocation10]  }
  0x41   :  { %542 = vmatprep.subr.bf16.mxu0 %v607_v25  ;;  %v165_v50 = vrot.slane %v160_v48, %v164_v47  ;;  %v169_v51 = vrot.slane %v160_v48, %v168_v49  ;;  %v519_v0 = vld [vmem:[%s819_s6] ss:$0 sm:$0xff]  ;;  %s489_s26 = sshll.u32 %s742_s4, 4  ;;  %s490_s26 = int_to_ptr.vmem [resolvable:$true] %s489_s26 }
  0x42   :  { %s703_s6 = scalar_lea.vmem %s490_s26, 64  ;;  %p708_p7 = scmp.lt.s32.totalorder %s490_s26, %s490_s26 }
  0x43   :  { %259 = vmatpush1.bf16.msra.mxu1 %v590_v11  ;;  %p704_p6 = scmp.ne.s32.totalorder %s490_s26, %s703_s6  ;;  %p709_p8 = scmp.lt.s32.totalorder %s703_s6, %s703_s6 }
  0x44   :  { %260 = vmatprep.subr.bf16.mxu1 %v591_v12  ;;  %543 = vmatpush3.bf16.msra.mxu0 %v608_v26 }
  0x45   :  { %544 = vmatprep.subr.bf16.mxu0 %v609_v27  ;;  %p710_p9 = por %p709_p8, %p708_p7 }
  0x47   :  { %261 = vmatpush1.bf16.msra.mxu1 %v593_v13  ;;  %p711_p10 = pnand %p710_p9, %p704_p6 }
  0x48   :  { %262 = vmatprep.subr.bf16.mxu1 %v594_v14  ;;  %545 = vmatpush3.bf16.msra.mxu0 %v610_v28 }
  0x49   :  { %546 = vmatprep.subr.bf16.mxu0 %v611_v29 }
  0x4b   :  { %263 = vmatpush1.bf16.msra.mxu1 %v596_v15 }
  0x4c   :  { %264 = vmatprep.subr.bf16.mxu1 %v597_v16  ;;  %547 = vmatpush3.bf16.msra.mxu0 %v612_v30 }
  0x4d   :  { %548 = vmatprep.subr.bf16.mxu0 %v613_v31 }
  0x4f   :  { %265 = vmatpush1.bf16.msra.mxu1 %v599_v17 }
  0x50   :  { %266 = vmatprep.subr.bf16.mxu1 %v600_v18  ;;  %549 = vmatpush3.bf16.msra.mxu0 %v614_v32 }
  0x51   :  { %550 = vmatprep.subr.bf16.mxu0 %v615_v41 }
  0x53   :  { %267 = vmatpush1.bf16.msra.mxu1 %v602_v19 }
  0x54   :  { %551 = vmatpush3.bf16.msra.mxu0 %v616_v42 }
  0x55   :  { %552 = vmatprep.subr.bf16.mxu0 %v617_v43 }
  0x58   :  { %553 = vmatpush3.bf16.msra.mxu0 %v618_v44 }
  0xf9   :  { %v136_v34 = vpop.f32.mrf.mxu0 }
  0xfa   :  { %v137_v35 = vadd.f32 %v500_v33, %v136_v34 }
  0xfb   :  { %v564_v36 = vpop.f32.mrf.mxu0 }
  0xfc   :  { %v142_v37 = vmax.f32 %v137_v35, 0.0 }
  0xfd   :  { %v139_v38 = vpop.f32.mrf.mxu0 }
  0xfe   :  { %v143_v39 = vpack.c.bf16 %v142_v37, %v142_v37 }
  0xff   :  { %v565_v40 = vpop.f32.mrf.mxu0 }
 0x100   :  { %285 = vmatmul.mubr.bf16.vlgmr.msra.gmra.mxu1 %v143_v39 }
 0x1c0   :  { %v286_v52 = vpop.f32.mrf.mxu1 }
 0x1c1   :  { %v287_v53 = vadd.f32 %v286_v52, %v165_v50 }
 0x1c2   :  { %v288_v54 = vpop.f32.mrf.mxu1 }
 0x1c3   :  { %v289_v55 = vadd.f32 %v288_v54, %v169_v51  ;;  %v293_v56 = vmax.f32 %v287_v53, 0.0 }
 0x1c4   :  { %v290_v57 = vpop.f32.mrf.mxu1 }
 0x1c5   :  { %v294_v58 = vmax.f32 %v289_v55, 0.0  ;;  %v295_v61 = vpack.c.bf16 %v293_v56, %v293_v56 }
 0x1c6   :  { %v291_v59 = vpop.f32.mrf.mxu1 }
 0x1c7   :  { %v296_v60 = vpack.c.bf16 %v294_v58, %v294_v58 }
 0x1c9   :  { %464 = vmatprep.mubr.bf16.mxu0 %v296_v60 }
 0x1ca   :  { %465 = vmatmul.mubr.bf16.vlgmr.msra.gmra.mxu0 %v295_v61 }
 0x28a   :  { %v554_v62 = vpop.f32.mrf.mxu0 }
 0x28c   :  { %v555_v63 = vpop.f32.mrf.mxu0 }
 0x28d   :  { %v556_v1 = vadd.f32 %v555_v63, %v554_v62 }
 0x28e   :  { %v557_v2 = vpop.f32.mrf.mxu0 }
 0x28f   :  { %v467_v3 = vadd.f32 %v556_v1, %v519_v0 }
 0x290   :  { %v558_v4 = vpop.f32.mrf.mxu0 }
 0x291   :  { %472 = vmax.xlane.f32.xlu0 %v467_v3 }
 0x31a   :  { %v473_v5 = vpop.xlane.xlu0 %472 }
 0x31b   :  { %v474_v6 = vsub.f32 %v467_v3, %v473_v5 }
 0x31d   :  { %v475_v7 = vmul.f32 1.442695, %v474_v6 }
 0x31f   :  { %619 = vpow2.f32 %v475_v7 }
 0x32c   :  { %v620_v8 = vpop.eup %619 }
 0x32d   :  { %477 = vadd.xlane.f32.xlu0 %v620_v8 }
 0x3b6   :  { %v478_v9 = vpop.xlane.xlu0 %477 }
 0x3b7   :  { %621 = vrcp.f32 %v478_v9 }
 0x3c4   :  { %v622_v10 = vpop.eup %621 }
 0x3c5   :  { %v480_v11 = vmul.f32 %v622_v10, %v620_v8 }
 0x3c7   :  { %v481_v12 = vpack.c.bf16 %v480_v11, %v480_v11 }
 0x3c9   :  { %482 = vst [vmem:[#allocation10] sm:$0xf] %v481_v12 }
 0x3ca   :  { %714 = shalt.err (!%p711_p10)
}
 0x3cb   :  { %492 = dma.vmem_to_hbm [thread:$0]  %s490_s26, 64, %s820_s7, [#allocation4]  }
 0x3cc   :  { %729 = dma.done.wait [#allocation4], 64  }
 0x3cd   :  { %730 = vsyncadd [#allocation4], 4294967232 }
 0x3ce   :  { %496 = vsyncpa [#allocation3], 1 }
 0x3cf   :  { %497 = vsyncpa [#allocation6], 1 }
 0x3d0   :  { %498 = vsyncpa [#allocation9], 1 }
 0x3d1   :  { %499 = vsyncpa [#allocation4], 1 }

</bundles_post_ra>
